<compile_context>
chip_gen: v7x
topology: tpu7x:2x2x1
jax: 0.10.0
libtpu: 0.0.40
codegen_flags: <defaults>
</compile_context>

<pallas_src>
import functools

import jax
import jax.numpy as jnp
from jax.experimental import pallas as pl
from jax.experimental.pallas import tpu as pltpu


# --------------------------------------------------------------------------- #
# Kernel
# --------------------------------------------------------------------------- #
def _vq_kernel(x_ref, w_ref, b_ref, embt_ref, e2h_ref,
               q_ref, idx_ref, sq_ref, cnt_ref,
               *, tile_n, n_actual, use_bf16):
    # x_ref:    (TILE_N, In)  input tile (pipelined, double-buffered)
    # w_ref:    (In, D)       weight_proj.weight.T          -- resident
    # b_ref:    (1, D)        bias                           -- resident
    # embt_ref: (D, M)        codebook transposed (ONLY copy)-- resident
    # e2h_ref:  (1, M)        -0.5 * ||e||^2 (hoisted)       -- resident
    x = x_ref[...]
    w = w_ref[...]
    embt_f32 = embt_ref[...]
    if use_bf16:
        # bf16 MXU operands (3-4x matmul throughput). Argmax may differ for
        # near-tie codes; the onehot@codebook gather stays f32 so quantized
        # values themselves remain exact.
        x = x.astype(jnp.bfloat16)
        w = w.astype(jnp.bfloat16)
        embt_mm = embt_f32.astype(jnp.bfloat16)
    else:
        embt_mm = embt_f32

    # ---- weight_proj (Linear) on the MXU, f32 accumulation ----
    xp = jnp.dot(x, w, preferred_element_type=jnp.float32) + b_ref[...]
    xp_mm = xp.astype(jnp.bfloat16) if use_bf16 else xp

    # ---- nearest code:  argmin ||xp - e||^2  ==  argmax (xp.e - 0.5||e||^2)
    # (||xp||^2 is row-constant and dropped; -0.5||e||^2 precomputed in XLA).
    score = jnp.dot(xp_mm, embt_mm, preferred_element_type=jnp.float32) + e2h_ref[...]
    idx = jnp.argmax(score, axis=-1).astype(jnp.int32)          # (TILE_N,)

    m = score.shape[-1]
    onehot = (jax.lax.broadcasted_iota(jnp.int32, (tile_n, m), 1)
              == idx[:, None]).astype(jnp.float32)              # (TILE_N, M)

    # ---- codebook gather through the MXU using the single (D, M) copy:
    # contract the M axes of onehot and emb^T -> (TILE_N, D), exact f32.
    quant = jax.lax.dot_general(
        onehot, embt_f32,
        dimension_numbers=(((1,), (1,)), ((), ())),
        preferred_element_type=jnp.float32)

    # ---- ragged-final-tile masks: rows beyond the real N are garbage; gate
    # them NaN-safely out of the loss / count partials (their q rows are
    # discarded by the boundary writeback, their idx lanes sliced off).
    row0 = pl.program_id(0) * tile_n
    valid_col = (jax.lax.broadcasted_iota(jnp.int32, (tile_n, 1), 0) + row0) < n_actual
    valid_row = ((jax.lax.broadcasted_iota(jnp.int32, (1, tile_n), 1) + row0)
                 < n_actual).astype(jnp.float32)

    diff = jnp.where(valid_col, xp - quant, 0.0)
    tile_sq = jnp.sum(diff * diff)                              # scalar partial

    # ---- per-code counts routed through the MXU (slack when mem-bound) ----
    cnt = jnp.dot(valid_row, onehot, preferred_element_type=jnp.float32)   # (1, M)

    # ---- outputs ----
    q_ref[...] = quant.astype(q_ref.dtype)
    idx_ref[...] = idx[None, None, :]
    sq_ref[...] = jnp.broadcast_to(tile_sq, (1, 1, 128)).astype(jnp.float32)
    cnt_ref[...] = cnt[None]


# --------------------------------------------------------------------------- #
# Generation-aware sizing
# --------------------------------------------------------------------------- #
def _vmem_limit_bytes():
    cap = 64 * 1024 * 1024                      # conservative default (v7x)
    try:
        info = pltpu.get_tpu_info()
        cap = int(getattr(info, "vmem_capacity_bytes", cap))
    except Exception:
        pass
    # <= ~48 MiB on v7x (64 MiB physical), ~96-100 MiB on v5e/v6e (128 MiB).
    return min(cap * 3 // 4, 100 * 1024 * 1024)


def _auto_tile_n(input_dim, d, m, vmem_limit):
    # Resident (single codebook copy); assume double-buffered as a worst case.
    resident = 4 * (input_dim * d + d + d * m + m) * 2
    # Approx bytes per tile row: double-buffered x/q tiles + f32 intermediates
    # (xp, quant, score, onehot, scratch) + slack.
    per_row = 4 * (2 * input_dim + 2 * d + 2 * d + 3 * m + 16)
    budget = vmem_limit - resident - (4 << 20)
    t = budget // max(per_row, 1)
    t = (t // 256) * 256                        # 256-aligned (MXU-friendly on v6e+)
    return int(max(256, min(2048, t)))


# --------------------------------------------------------------------------- #
# Wrapper
# --------------------------------------------------------------------------- #
def vq_embedding_forward(x, w_proj, b_proj, embedding, commitment_cost=0.25,
                         tile_n=None, use_bf16_matmul=False):
    """x: (..., input_dim) -> dict matching VQEmbedding.forward outputs.

    w_proj is stored as (input_dim, D) (i.e. nn.Linear weight transposed)."""
    *lead, input_dim = x.shape
    M, D = embedding.shape
    N = 1
    for s in lead:
        N *= s

    vmem_limit = _vmem_limit_bytes()
    if tile_n is None:
        tile_n = _auto_tile_n(input_dim, D, M, vmem_limit)
    # Keep block <= array along N: whole array if small, else a 128-multiple.
    if N <= 128:
        tile_n = N
    else:
        tile_n = max(128, min((tile_n // 128) * 128, (N // 128) * 128))
    num_tiles = pl.cdiv(N, tile_n)

    # Big tensors stay unpadded; small resident arrays are prepared once in XLA.
    x_flat = x.reshape(N, input_dim).astype(jnp.float32)
    w = w_proj.astype(jnp.float32)                       # (input_dim, D)
    b = b_proj.astype(jnp.float32).reshape(1, D)
    emb = embedding.astype(jnp.float32)                  # (M, D)
    embt = emb.T                                         # (D, M)  single resident copy
    e2h = (-0.5 * jnp.sum(emb * emb, axis=1)).reshape(1, M)

    kernel = functools.partial(_vq_kernel, tile_n=tile_n, n_actual=N,
                               use_bf16=use_bf16_matmul)

    out_shape = [
        jax.ShapeDtypeStruct((N, D), jnp.float32),              # quantized (true shape)
        jax.ShapeDtypeStruct((num_tiles, 1, tile_n), jnp.int32),  # indices (lane-dense)
        jax.ShapeDtypeStruct((num_tiles, 1, 128), jnp.float32),   # partial sq-error
        jax.ShapeDtypeStruct((num_tiles, 1, M), jnp.float32),     # partial code counts
    ]
    out_specs = [
        pl.BlockSpec((tile_n, D), lambda i: (i, 0)),
        pl.BlockSpec((1, 1, tile_n), lambda i: (i, 0, 0)),
        pl.BlockSpec((1, 1, 128), lambda i: (i, 0, 0)),
        pl.BlockSpec((1, 1, M), lambda i: (i, 0, 0)),
    ]

    def _run(single_buffer_resident):
        res_kwargs = ({"pipeline_mode": pl.Buffered(1)}
                      if single_buffer_resident else {})
        in_specs = [
            pl.BlockSpec((tile_n, input_dim), lambda i: (i, 0)),       # x (pipelined)
            pl.BlockSpec((input_dim, D), lambda i: (0, 0), **res_kwargs),  # w
            pl.BlockSpec((1, D), lambda i: (0, 0), **res_kwargs),         # b
            pl.BlockSpec((D, M), lambda i: (0, 0), **res_kwargs),         # emb^T
            pl.BlockSpec((1, M), lambda i: (0, 0), **res_kwargs),         # -0.5||e||^2
        ]
        return pl.pallas_call(
            kernel,
            grid=(num_tiles,),
            in_specs=in_specs,
            out_specs=out_specs,
            out_shape=out_shape,
            compiler_params=pltpu.CompilerParams(
                dimension_semantics=("parallel",),
                vmem_limit_bytes=int(vmem_limit)),
        )(x_flat, w, b, embt, e2h)

    try:
        q_out, idx_out, sq_part, cnt_part = _run(True)
    except Exception:
        # pl.Buffered(1) (single-buffered resident blocks) not supported by
        # this jax build -- fall back to default double-buffering.
        q_out, idx_out, sq_part, cnt_part = _run(False)

    # ---- tiny scalar finalization in XLA ----
    total_sq = jnp.sum(sq_part[:, 0, 0])
    mse = total_sq / (N * D)
    loss = (1.0 + commitment_cost) * mse          # q_latent + beta * e_latent (equal fwd)

    counts = jnp.sum(cnt_part[:, 0, :], axis=0)   # (M,)
    avg_probs = counts / N
    perplexity = jnp.exp(-jnp.sum(avg_probs * jnp.log(avg_probs + 1e-10)))

    q = q_out.reshape(*lead, D)
    idx_flat = idx_out.reshape(-1)
    idx = idx_flat if idx_flat.shape[0] == N else idx_flat[:N]

    return {"x": q, "vq_loss": loss, "encoding_indices": idx,
            "perplexity": perplexity}


# --------------------------------------------------------------------------- #
# Pure-JAX reference mirroring the PyTorch forward
# --------------------------------------------------------------------------- #
def _reference(x, w_proj, b_proj, embedding, commitment_cost=0.25):
    M, D = embedding.shape
    xp = x @ w_proj + b_proj
    x_flat = xp.reshape(-1, D)
    dist = (jnp.sum(embedding ** 2, axis=1)
            + jnp.sum(x_flat ** 2, axis=1, keepdims=True)
            - 2.0 * x_flat @ embedding.T)
    idx = jnp.argmin(dist, axis=-1)
    enc = jax.nn.one_hot(idx, M, dtype=jnp.float32)
    quant = embedding[idx].reshape(xp.shape)
    mse = jnp.mean((xp - quant) ** 2)
    loss = mse + commitment_cost * mse
    avg = jnp.mean(enc, axis=0)
    perp = jnp.exp(-jnp.sum(avg * jnp.log(avg + 1e-10)))
    return {"x": quant, "vq_loss": loss, "encoding_indices": idx, "perplexity": perp}


if __name__ == "__main__":
    # Shapes consistent with the module: (B, T, input_dim) flattened to N vectors.
    B, T = 2, 8
    input_dim = 32
    embedding_dim = 32   # D
    n_embeddings = 16    # M
    commitment_cost = 0.25

    key = jax.random.PRNGKey(0)
    kx, kw, kb, ke, kx2 = jax.random.split(key, 5)

    x = jax.random.normal(kx, (B, T, input_dim), dtype=jnp.float32)
    w_proj = jax.random.normal(kw, (input_dim, embedding_dim), dtype=jnp.float32) * 0.1
    b_proj = jax.random.normal(kb, (embedding_dim,), dtype=jnp.float32) * 0.1
    init_bound = 1.0 / n_embeddings
    embedding = jax.random.uniform(
        ke, (n_embeddings, embedding_dim), dtype=jnp.float32,
        minval=-init_bound, maxval=init_bound)

    # ---- test 1: exact comparison against the reference (single tile) ----
    out = vq_embedding_forward(x, w_proj, b_proj, embedding, commitment_cost)
    jax.block_until_ready(out)
    ref = _reference(x, w_proj, b_proj, embedding, commitment_cost)
    assert jnp.allclose(out["x"], ref["x"], atol=1e-4, rtol=1e-4)
    assert jnp.allclose(out["vq_loss"], ref["vq_loss"], atol=1e-5, rtol=1e-5)
    assert jnp.array_equal(out["encoding_indices"],
                           ref["encoding_indices"].astype(jnp.int32))
    assert jnp.allclose(out["perplexity"], ref["perplexity"], atol=1e-4, rtol=1e-4)

    # ---- test 2: ragged final tile (N=200, tile=128) -- tie-robust checks ----
    x2 = jax.random.normal(kx2, (2, 100, input_dim), dtype=jnp.float32)
    out2 = vq_embedding_forward(x2, w_proj, b_proj, embedding, commitment_cost)
    jax.block_until_ready(out2)
    xp2 = (x2 @ w_proj + b_proj).reshape(-1, embedding_dim)
    d2 = (jnp.sum(embedding ** 2, axis=1)
          + jnp.sum(xp2 ** 2, axis=1, keepdims=True)
          - 2.0 * xp2 @ embedding.T)
    idx2 = out2["encoding_indices"]
    picked = jnp.take_along_axis(d2, idx2[:, None], axis=1)[:, 0]
    assert bool(jnp.all(picked <= jnp.min(d2, axis=1) + 1e-4))      # nearest code
    assert jnp.allclose(out2["x"].reshape(-1, embedding_dim),
                        embedding[idx2], atol=1e-5)                 # exact gather
    mse2 = jnp.mean((xp2 - embedding[idx2]) ** 2)
    assert jnp.allclose(out2["vq_loss"], (1.0 + commitment_cost) * mse2,
                        atol=1e-5, rtol=1e-5)
    avg2 = jnp.mean(jax.nn.one_hot(idx2, n_embeddings, dtype=jnp.float32), axis=0)
    ppl2 = jnp.exp(-jnp.sum(avg2 * jnp.log(avg2 + 1e-10)))
    assert jnp.allclose(out2["perplexity"], ppl2, atol=1e-4, rtol=1e-4)

    print("KERNEL_OK")
</pallas_src>

<mosaic_0001>
module attributes {stable_mosaic.version = 11 : i64} {
  func.func @_vq_kernel(%arg0: i32, %arg1: memref<16x32xf32, #tpu.memory_space<vmem>>, %arg2: memref<32x32xf32, #tpu.memory_space<vmem>>, %arg3: memref<1x32xf32, #tpu.memory_space<vmem>>, %arg4: memref<32x16xf32, #tpu.memory_space<vmem>>, %arg5: memref<1x16xf32, #tpu.memory_space<vmem>>, %arg6: memref<16x32xf32, #tpu.memory_space<vmem>>, %arg7: memref<1x1x16xi32, #tpu.memory_space<vmem>>, %arg8: memref<1x1x128xf32, #tpu.memory_space<vmem>>, %arg9: memref<1x1x16xf32, #tpu.memory_space<vmem>>) attributes {dimension_semantics = [#tpu.dimension_semantics<parallel>], iteration_bounds = array<i64: 1>, scalar_prefetch = 0 : i64, scratch_operands = 0 : i64, tpu.core_type = #tpu.core_type<tc>, window_params = [{transform_indices = @transform_0, window_bounds = array<i64: 16, 32>}, {pipeline_mode = #tpu.pipeline_mode<synchronous>, transform_indices = @transform_1, window_bounds = array<i64: 32, 32>}, {pipeline_mode = #tpu.pipeline_mode<synchronous>, transform_indices = @transform_2, window_bounds = array<i64: 1, 32>}, {pipeline_mode = #tpu.pipeline_mode<synchronous>, transform_indices = @transform_3, window_bounds = array<i64: 32, 16>}, {pipeline_mode = #tpu.pipeline_mode<synchronous>, transform_indices = @transform_4, window_bounds = array<i64: 1, 16>}, {transform_indices = @transform_5, window_bounds = array<i64: 16, 32>}, {transform_indices = @transform_6, window_bounds = array<i64: 1, 1, 16>}, {transform_indices = @transform_7, window_bounds = array<i64: 1, 1, 128>}, {transform_indices = @transform_8, window_bounds = array<i64: 1, 1, 16>}]} {
    %c0 = arith.constant 0 : index
    %c0_0 = arith.constant 0 : index
    %0 = vector.load %arg1[%c0, %c0_0] : memref<16x32xf32, #tpu.memory_space<vmem>>, vector<16x32xf32>
    %c0_1 = arith.constant 0 : index
    %c0_2 = arith.constant 0 : index
    %1 = vector.load %arg2[%c0_1, %c0_2] : memref<32x32xf32, #tpu.memory_space<vmem>>, vector<32x32xf32>
    %c0_3 = arith.constant 0 : index
    %c0_4 = arith.constant 0 : index
    %2 = vector.load %arg4[%c0_3, %c0_4] : memref<32x16xf32, #tpu.memory_space<vmem>>, vector<32x16xf32>
    %cst = arith.constant dense<0.000000e+00> : vector<16x32xf32>
    %3 = tpu.matmul %0, %1, %cst {dimension_numbers = #tpu.dot_dimension_numbers<[1], [0], [0], [1], [0, 0, 1, 1], [], []>} : vector<16x32xf32>, vector<32x32xf32>, vector<16x32xf32> -> vector<16x32xf32>
    %c0_5 = arith.constant 0 : index
    %c0_6 = arith.constant 0 : index
    %4 = vector.load %arg3[%c0_5, %c0_6] : memref<1x32xf32, #tpu.memory_space<vmem>>, vector<1x32xf32>
    %5 = vector.broadcast %4 : vector<1x32xf32> to vector<16x32xf32>
    %6 = arith.addf %3, %5 : vector<16x32xf32>
    %cst_7 = arith.constant dense<0.000000e+00> : vector<16x16xf32>
    %7 = tpu.matmul %6, %2, %cst_7 {dimension_numbers = #tpu.dot_dimension_numbers<[1], [0], [0], [1], [0, 0, 1, 1], [], []>} : vector<16x32xf32>, vector<32x16xf32>, vector<16x16xf32> -> vector<16x16xf32>
    %c0_8 = arith.constant 0 : index
    %c0_9 = arith.constant 0 : index
    %8 = vector.load %arg5[%c0_8, %c0_9] : memref<1x16xf32, #tpu.memory_space<vmem>>, vector<1x16xf32>
    %9 = vector.broadcast %8 : vector<1x16xf32> to vector<16x16xf32>
    %10 = arith.addf %7, %9 : vector<16x16xf32>
    %11 = tpu.reduce_index %10 {axis = 1 : i32, kind = #tpu.reduction_kind<arg_max>} : vector<16x16xf32> -> vector<16xi32>
    %12 = tpu.iota {dimensions = array<i32: 1>} : vector<16x16xi32>
    %13 = vector.shape_cast %11 : vector<16xi32> to vector<16x1xi32>
    %14 = vector.broadcast %13 : vector<16x1xi32> to vector<16x16xi32>
    %15 = arith.cmpi eq, %12, %14 : vector<16x16xi32>
    %16 = arith.extui %15 : vector<16x16xi1> to vector<16x16xi32>
    %17 = arith.sitofp %16 : vector<16x16xi32> to vector<16x16xf32>
    %cst_10 = arith.constant dense<0.000000e+00> : vector<16x32xf32>
    %18 = tpu.matmul %17, %2, %cst_10 {dimension_numbers = #tpu.dot_dimension_numbers<[1], [1], [0], [0], [0, 0, 1, 0], [], []>} : vector<16x16xf32>, vector<32x16xf32>, vector<16x32xf32> -> vector<16x32xf32>
    %c16_i32 = arith.constant 16 : i32
    %19 = arith.muli %arg0, %c16_i32 : i32
    %20 = tpu.iota {dimensions = array<i32: 0>} : vector<16x1xi32>
    %21 = vector.broadcast %19 : i32 to vector<16x1xi32>
    %22 = arith.addi %20, %21 : vector<16x1xi32>
    %c16_i32_11 = arith.constant 16 : i32
    %23 = vector.broadcast %c16_i32_11 : i32 to vector<16x1xi32>
    %24 = arith.cmpi slt, %22, %23 : vector<16x1xi32>
    %25 = tpu.iota {dimensions = array<i32: 1>} : vector<1x16xi32>
    %26 = vector.broadcast %19 : i32 to vector<1x16xi32>
    %27 = arith.addi %25, %26 : vector<1x16xi32>
    %c16_i32_12 = arith.constant 16 : i32
    %28 = vector.broadcast %c16_i32_12 : i32 to vector<1x16xi32>
    %29 = arith.cmpi slt, %27, %28 : vector<1x16xi32>
    %30 = arith.extui %29 : vector<1x16xi1> to vector<1x16xi32>
    %31 = arith.sitofp %30 : vector<1x16xi32> to vector<1x16xf32>
    %32 = arith.subf %6, %18 : vector<16x32xf32>
    %cst_13 = arith.constant 0.000000e+00 : f32
    %33 = vector.shape_cast %24 : vector<16x1xi1> to vector<16x1xi1>
    %34 = vector.broadcast %33 : vector<16x1xi1> to vector<16x32xi1>
    %35 = vector.broadcast %cst_13 : f32 to vector<16x32xf32>
    %36 = arith.select %34, %32, %35 : vector<16x32xi1>, vector<16x32xf32>
    %37 = arith.mulf %36, %36 : vector<16x32xf32>
    %38 = vector.shape_cast %37 : vector<16x32xf32> to vector<1x16x32xf32>
    %cst_14 = arith.constant dense<0.000000e+00> : vector<1xf32>
    %39 = vector.multi_reduction <add>, %38, %cst_14 [1, 2] : vector<1x16x32xf32> to vector<1xf32>
    %40 = vector.shape_cast %39 : vector<1xf32> to vector<1x1x1xf32>
    %41 = vector.extract %40[0, 0, 0] : f32 from vector<1x1x1xf32>
    %cst_15 = arith.constant dense<0.000000e+00> : vector<1x16xf32>
    %42 = tpu.matmul %31, %17, %cst_15 {dimension_numbers = #tpu.dot_dimension_numbers<[1], [0], [0], [1], [0, 0, 1, 1], [], []>} : vector<1x16xf32>, vector<16x16xf32>, vector<1x16xf32> -> vector<1x16xf32>
    %c0_16 = arith.constant 0 : index
    %c0_17 = arith.constant 0 : index
    %43 = vector.load %arg6[%c0_16, %c0_17] : memref<16x32xf32, #tpu.memory_space<vmem>>, vector<16x32xf32>
    tpu.vector_store %arg6[%c0_16, %c0_17], %18 {strides = array<i32>} : memref<16x32xf32, #tpu.memory_space<vmem>>, vector<16x32xf32>,
    %44 = vector.shape_cast %11 : vector<16xi32> to vector<1x1x16xi32>
    %c0_18 = arith.constant 0 : index
    %c0_19 = arith.constant 0 : index
    %c0_20 = arith.constant 0 : index
    %45 = vector.load %arg7[%c0_18, %c0_19, %c0_20] : memref<1x1x16xi32, #tpu.memory_space<vmem>>, vector<1x1x16xi32>
    tpu.vector_store %arg7[%c0_18, %c0_19, %c0_20], %44 {strides = array<i32>} : memref<1x1x16xi32, #tpu.memory_space<vmem>>, vector<1x1x16xi32>,
    %46 = vector.broadcast %41 : f32 to vector<1x1x128xf32>
    %c0_21 = arith.constant 0 : index
    %c0_22 = arith.constant 0 : index
    %c0_23 = arith.constant 0 : index
    %47 = vector.load %arg8[%c0_21, %c0_22, %c0_23] : memref<1x1x128xf32, #tpu.memory_space<vmem>>, vector<1x1x128xf32>
    tpu.vector_store %arg8[%c0_21, %c0_22, %c0_23], %46 {strides = array<i32>} : memref<1x1x128xf32, #tpu.memory_space<vmem>>, vector<1x1x128xf32>,
    %48 = vector.shape_cast %42 : vector<1x16xf32> to vector<1x1x16xf32>
    %c0_24 = arith.constant 0 : index
    %c0_25 = arith.constant 0 : index
    %c0_26 = arith.constant 0 : index
    %49 = vector.load %arg9[%c0_24, %c0_25, %c0_26] : memref<1x1x16xf32, #tpu.memory_space<vmem>>, vector<1x1x16xf32>
    tpu.vector_store %arg9[%c0_24, %c0_25, %c0_26], %48 {strides = array<i32>} : memref<1x1x16xf32, #tpu.memory_space<vmem>>, vector<1x1x16xf32>,
    return
  }
  func.func @transform_0(%arg0: i32) -> (i32, i32) {
    %c0_i32 = arith.constant 0 : i32
    %c0_i32_0 = arith.constant 0 : i32
    return %arg0, %c0_i32 : i32, i32
  }
  func.func @transform_1(%arg0: i32) -> (i32, i32) {
    %c0_i32 = arith.constant 0 : i32
    %c0_i32_0 = arith.constant 0 : i32
    %c0_i32_1 = arith.constant 0 : i32
    return %c0_i32, %c0_i32_0 : i32, i32
  }
  func.func @transform_2(%arg0: i32) -> (i32, i32) {
    %c0_i32 = arith.constant 0 : i32
    %c0_i32_0 = arith.constant 0 : i32
    %c0_i32_1 = arith.constant 0 : i32
    return %c0_i32, %c0_i32_0 : i32, i32
  }
  func.func @transform_3(%arg0: i32) -> (i32, i32) {
    %c0_i32 = arith.constant 0 : i32
    %c0_i32_0 = arith.constant 0 : i32
    %c0_i32_1 = arith.constant 0 : i32
    return %c0_i32, %c0_i32_0 : i32, i32
  }
  func.func @transform_4(%arg0: i32) -> (i32, i32) {
    %c0_i32 = arith.constant 0 : i32
    %c0_i32_0 = arith.constant 0 : i32
    %c0_i32_1 = arith.constant 0 : i32
    return %c0_i32, %c0_i32_0 : i32, i32
  }
  func.func @transform_5(%arg0: i32) -> (i32, i32) {
    %c0_i32 = arith.constant 0 : i32
    %c0_i32_0 = arith.constant 0 : i32
    return %arg0, %c0_i32 : i32, i32
  }
  func.func @transform_6(%arg0: i32) -> (i32, i32, i32) {
    %c0_i32 = arith.constant 0 : i32
    %c0_i32_0 = arith.constant 0 : i32
    %c0_i32_1 = arith.constant 0 : i32
    return %arg0, %c0_i32, %c0_i32_0 : i32, i32, i32
  }
  func.func @transform_7(%arg0: i32) -> (i32, i32, i32) {
    %c0_i32 = arith.constant 0 : i32
    %c0_i32_0 = arith.constant 0 : i32
    %c0_i32_1 = arith.constant 0 : i32
    return %arg0, %c0_i32, %c0_i32_0 : i32, i32, i32
  }
  func.func @transform_8(%arg0: i32) -> (i32, i32, i32) {
    %c0_i32 = arith.constant 0 : i32
    %c0_i32_0 = arith.constant 0 : i32
    %c0_i32_1 = arith.constant 0 : i32
    return %arg0, %c0_i32, %c0_i32_0 : i32, i32, i32
  }
}

module attributes {stable_mosaic.version = 11 : i64} {
  func.func @_vq_kernel(%arg0: i32, %arg1: memref<16x32xf32, #tpu.memory_space<vmem>>, %arg2: memref<32x32xf32, #tpu.memory_space<vmem>>, %arg3: memref<1x32xf32, #tpu.memory_space<vmem>>, %arg4: memref<32x16xf32, #tpu.memory_space<vmem>>, %arg5: memref<1x16xf32, #tpu.memory_space<vmem>>, %arg6: memref<16x32xf32, #tpu.memory_space<vmem>>, %arg7: memref<1x1x16xi32, #tpu.memory_space<vmem>>, %arg8: memref<1x1x128xf32, #tpu.memory_space<vmem>>, %arg9: memref<1x1x16xf32, #tpu.memory_space<vmem>>) attributes {dimension_semantics = [#tpu.dimension_semantics<parallel>], iteration_bounds = array<i64: 1>, scalar_prefetch = 0 : i64, scratch_operands = 0 : i64, tpu.core_type = #tpu.core_type<tc>, window_params = [{transform_indices = @transform_0, window_bounds = array<i64: 16, 32>}, {pipeline_mode = #tpu.pipeline_mode<synchronous>, transform_indices = @transform_1, window_bounds = array<i64: 32, 32>}, {pipeline_mode = #tpu.pipeline_mode<synchronous>, transform_indices = @transform_2, window_bounds = array<i64: 1, 32>}, {pipeline_mode = #tpu.pipeline_mode<synchronous>, transform_indices = @transform_3, window_bounds = array<i64: 32, 16>}, {pipeline_mode = #tpu.pipeline_mode<synchronous>, transform_indices = @transform_4, window_bounds = array<i64: 1, 16>}, {transform_indices = @transform_5, window_bounds = array<i64: 16, 32>}, {transform_indices = @transform_6, window_bounds = array<i64: 1, 1, 16>}, {transform_indices = @transform_7, window_bounds = array<i64: 1, 1, 128>}, {transform_indices = @transform_8, window_bounds = array<i64: 1, 1, 16>}]} {
    %c0 = arith.constant 0 : index
    %c0_0 = arith.constant 0 : index
    %0 = vector.load %arg1[%c0, %c0_0] : memref<16x32xf32, #tpu.memory_space<vmem>>, vector<16x32xf32>
    %c0_1 = arith.constant 0 : index
    %c0_2 = arith.constant 0 : index
    %1 = vector.load %arg2[%c0_1, %c0_2] : memref<32x32xf32, #tpu.memory_space<vmem>>, vector<32x32xf32>
    %c0_3 = arith.constant 0 : index
    %c0_4 = arith.constant 0 : index
    %2 = vector.load %arg4[%c0_3, %c0_4] : memref<32x16xf32, #tpu.memory_space<vmem>>, vector<32x16xf32>
    %cst = arith.constant dense<0.000000e+00> : vector<16x32xf32>
    %3 = tpu.matmul %0, %1, %cst {dimension_numbers = #tpu.dot_dimension_numbers<[1], [0], [0], [1], [0, 0, 1, 1], [], []>} : vector<16x32xf32>, vector<32x32xf32>, vector<16x32xf32> -> vector<16x32xf32>
    %c0_5 = arith.constant 0 : index
    %c0_6 = arith.constant 0 : index
    %4 = vector.load %arg3[%c0_5, %c0_6] : memref<1x32xf32, #tpu.memory_space<vmem>>, vector<1x32xf32>
    %5 = vector.broadcast %4 : vector<1x32xf32> to vector<16x32xf32>
    %6 = arith.addf %3, %5 : vector<16x32xf32>
    %cst_7 = arith.constant dense<0.000000e+00> : vector<16x16xf32>
    %7 = tpu.matmul %6, %2, %cst_7 {dimension_numbers = #tpu.dot_dimension_numbers<[1], [0], [0], [1], [0, 0, 1, 1], [], []>} : vector<16x32xf32>, vector<32x16xf32>, vector<16x16xf32> -> vector<16x16xf32>
    %c0_8 = arith.constant 0 : index
    %c0_9 = arith.constant 0 : index
    %8 = vector.load %arg5[%c0_8, %c0_9] : memref<1x16xf32, #tpu.memory_space<vmem>>, vector<1x16xf32>
    %9 = vector.broadcast %8 : vector<1x16xf32> to vector<16x16xf32>
    %10 = arith.addf %7, %9 : vector<16x16xf32>
    %11 = tpu.reduce_index %10 {axis = 1 : i32, kind = #tpu.reduction_kind<arg_max>} : vector<16x16xf32> -> vector<16xi32>
    %12 = tpu.iota {dimensions = array<i32: 1>} : vector<16x16xi32>
    %13 = vector.shape_cast %11 : vector<16xi32> to vector<16x1xi32>
    %14 = vector.broadcast %13 : vector<16x1xi32> to vector<16x16xi32>
    %15 = arith.cmpi eq, %12, %14 : vector<16x16xi32>
    %16 = arith.extui %15 : vector<16x16xi1> to vector<16x16xi32>
    %17 = arith.sitofp %16 : vector<16x16xi32> to vector<16x16xf32>
    %cst_10 = arith.constant dense<0.000000e+00> : vector<16x32xf32>
    %18 = tpu.matmul %17, %2, %cst_10 {dimension_numbers = #tpu.dot_dimension_numbers<[1], [1], [0], [0], [0, 0, 1, 0], [], []>} : vector<16x16xf32>, vector<32x16xf32>, vector<16x32xf32> -> vector<16x32xf32>
    %c16_i32 = arith.constant 16 : i32
    %19 = arith.muli %arg0, %c16_i32 : i32
    %20 = tpu.iota {dimensions = array<i32: 0>} : vector<16x1xi32>
    %21 = vector.broadcast %19 : i32 to vector<16x1xi32>
    %22 = arith.addi %20, %21 : vector<16x1xi32>
    %c16_i32_11 = arith.constant 16 : i32
    %23 = vector.broadcast %c16_i32_11 : i32 to vector<16x1xi32>
    %24 = arith.cmpi slt, %22, %23 : vector<16x1xi32>
    %25 = tpu.iota {dimensions = array<i32: 1>} : vector<1x16xi32>
    %26 = vector.broadcast %19 : i32 to vector<1x16xi32>
    %27 = arith.addi %25, %26 : vector<1x16xi32>
    %c16_i32_12 = arith.constant 16 : i32
    %28 = vector.broadcast %c16_i32_12 : i32 to vector<1x16xi32>
    %29 = arith.cmpi slt, %27, %28 : vector<1x16xi32>
    %30 = arith.extui %29 : vector<1x16xi1> to vector<1x16xi32>
    %31 = arith.sitofp %30 : vector<1x16xi32> to vector<1x16xf32>
    %32 = arith.subf %6, %18 : vector<16x32xf32>
    %cst_13 = arith.constant 0.000000e+00 : f32
    %33 = vector.shape_cast %24 : vector<16x1xi1> to vector<16x1xi1>
    %34 = vector.broadcast %33 : vector<16x1xi1> to vector<16x32xi1>
    %35 = vector.broadcast %cst_13 : f32 to vector<16x32xf32>
    %36 = arith.select %34, %32, %35 : vector<16x32xi1>, vector<16x32xf32>
    %37 = arith.mulf %36, %36 : vector<16x32xf32>
    %38 = vector.shape_cast %37 : vector<16x32xf32> to vector<1x16x32xf32>
    %cst_14 = arith.constant dense<0.000000e+00> : vector<1xf32>
    %39 = vector.multi_reduction <add>, %38, %cst_14 [1, 2] : vector<1x16x32xf32> to vector<1xf32>
    %40 = vector.shape_cast %39 : vector<1xf32> to vector<1x1x1xf32>
    %41 = vector.extract %40[0, 0, 0] : f32 from vector<1x1x1xf32>
    %cst_15 = arith.constant dense<0.000000e+00> : vector<1x16xf32>
    %42 = tpu.matmul %31, %17, %cst_15 {dimension_numbers = #tpu.dot_dimension_numbers<[1], [0], [0], [1], [0, 0, 1, 1], [], []>} : vector<1x16xf32>, vector<16x16xf32>, vector<1x16xf32> -> vector<1x16xf32>
    %c0_16 = arith.constant 0 : index
    %c0_17 = arith.constant 0 : index
    %43 = vector.load %arg6[%c0_16, %c0_17] : memref<16x32xf32, #tpu.memory_space<vmem>>, vector<16x32xf32>
    tpu.vector_store %arg6[%c0_16, %c0_17], %18 {strides = array<i32>} : memref<16x32xf32, #tpu.memory_space<vmem>>, vector<16x32xf32>,
    %44 = vector.shape_cast %11 : vector<16xi32> to vector<1x1x16xi32>
    %c0_18 = arith.constant 0 : index
    %c0_19 = arith.constant 0 : index
    %c0_20 = arith.constant 0 : index
    %45 = vector.load %arg7[%c0_18, %c0_19, %c0_20] : memref<1x1x16xi32, #tpu.memory_space<vmem>>, vector<1x1x16xi32>
    tpu.vector_store %arg7[%c0_18, %c0_19, %c0_20], %44 {strides = array<i32>} : memref<1x1x16xi32, #tpu.memory_space<vmem>>, vector<1x1x16xi32>,
    %46 = vector.broadcast %41 : f32 to vector<1x1x128xf32>
    %c0_21 = arith.constant 0 : index
    %c0_22 = arith.constant 0 : index
    %c0_23 = arith.constant 0 : index
    %47 = vector.load %arg8[%c0_21, %c0_22, %c0_23] : memref<1x1x128xf32, #tpu.memory_space<vmem>>, vector<1x1x128xf32>
    tpu.vector_store %arg8[%c0_21, %c0_22, %c0_23], %46 {strides = array<i32>} : memref<1x1x128xf32, #tpu.memory_space<vmem>>, vector<1x1x128xf32>,
    %48 = vector.shape_cast %42 : vector<1x16xf32> to vector<1x1x16xf32>
    %c0_24 = arith.constant 0 : index
    %c0_25 = arith.constant 0 : index
    %c0_26 = arith.constant 0 : index
    %49 = vector.load %arg9[%c0_24, %c0_25, %c0_26] : memref<1x1x16xf32, #tpu.memory_space<vmem>>, vector<1x1x16xf32>
    tpu.vector_store %arg9[%c0_24, %c0_25, %c0_26], %48 {strides = array<i32>} : memref<1x1x16xf32, #tpu.memory_space<vmem>>, vector<1x1x16xf32>,
    return
  }
  func.func @transform_0(%arg0: i32) -> (i32, i32) {
    %c0_i32 = arith.constant 0 : i32
    %c0_i32_0 = arith.constant 0 : i32
    return %arg0, %c0_i32 : i32, i32
  }
  func.func @transform_1(%arg0: i32) -> (i32, i32) {
    %c0_i32 = arith.constant 0 : i32
    %c0_i32_0 = arith.constant 0 : i32
    %c0_i32_1 = arith.constant 0 : i32
    return %c0_i32, %c0_i32_0 : i32, i32
  }
  func.func @transform_2(%arg0: i32) -> (i32, i32) {
    %c0_i32 = arith.constant 0 : i32
    %c0_i32_0 = arith.constant 0 : i32
    %c0_i32_1 = arith.constant 0 : i32
    return %c0_i32, %c0_i32_0 : i32, i32
  }
  func.func @transform_3(%arg0: i32) -> (i32, i32) {
    %c0_i32 = arith.constant 0 : i32
    %c0_i32_0 = arith.constant 0 : i32
    %c0_i32_1 = arith.constant 0 : i32
    return %c0_i32, %c0_i32_0 : i32, i32
  }
  func.func @transform_4(%arg0: i32) -> (i32, i32) {
    %c0_i32 = arith.constant 0 : i32
    %c0_i32_0 = arith.constant 0 : i32
    %c0_i32_1 = arith.constant 0 : i32
    return %c0_i32, %c0_i32_0 : i32, i32
  }
  func.func @transform_5(%arg0: i32) -> (i32, i32) {
    %c0_i32 = arith.constant 0 : i32
    %c0_i32_0 = arith.constant 0 : i32
    return %arg0, %c0_i32 : i32, i32
  }
  func.func @transform_6(%arg0: i32) -> (i32, i32, i32) {
    %c0_i32 = arith.constant 0 : i32
    %c0_i32_0 = arith.constant 0 : i32
    %c0_i32_1 = arith.constant 0 : i32
    return %arg0, %c0_i32, %c0_i32_0 : i32, i32, i32
  }
  func.func @transform_7(%arg0: i32) -> (i32, i32, i32) {
    %c0_i32 = arith.constant 0 : i32
    %c0_i32_0 = arith.constant 0 : i32
    %c0_i32_1 = arith.constant 0 : i32
    return %arg0, %c0_i32, %c0_i32_0 : i32, i32, i32
  }
  func.func @transform_8(%arg0: i32) -> (i32, i32, i32) {
    %c0_i32 = arith.constant 0 : i32
    %c0_i32_0 = arith.constant 0 : i32
    %c0_i32_1 = arith.constant 0 : i32
    return %arg0, %c0_i32, %c0_i32_0 : i32, i32, i32
  }
}

</mosaic_0001>

<bundles_post_ra>
// kernel: tpu_custom_call.1
= control target key start
LH: loop header
LB: loop body
LE: loop exit
PB: predicated region body
PF: predicated region fallthrough
CT: control target
= control target key end

     0   :  { %14 = vsyncpa [#allocation3], 0  ;;  %s877_s0 = inlined_call_operand.vmem [shape: f32[16,32], index: 0, kind: input, shape index: {}]   ;;  %s878_s1 = inlined_call_operand.vmem [shape: f32[32,32], index: 1, kind: input, shape index: {}]   ;;  %s879_s2 = inlined_call_operand.vmem [shape: f32[1,32], index: 2, kind: input, shape index: {}]   ;;  %s880_s3 = inlined_call_operand.vmem [shape: f32[32,16], index: 3, kind: input, shape index: {}]   ;;  %s881_s4 = inlined_call_operand.vmem [shape: f32[1,16], index: 4, kind: input, shape index: {}]   ;;  %s882_s5 = inlined_call_operand.hbm [shape: f32[16,32], index: 5, kind: output, shape index: {0}]   ;;  %s883_s6 = inlined_call_operand.hbm [shape: s32[1,1,16], index: 6, kind: output, shape index: {1}]   ;;  %s884_s7 = inlined_call_operand.hbm [shape: f32[1,1,128], index: 7, kind: output, shape index: {2}]   ;;  %s885_s8 = inlined_call_operand.hbm [shape: f32[1,1,16], index: 8, kind: output, shape index: {3}]  }
   0x1   :  { %15 = vsyncpa [#allocation5], 0  ;;  %v29_v0 = vld [vmem:[%s878_s1] sm:$0xff]  ;;  %v30_v1 = vld [vmem:[%s878_s1 + $0x8] sm:$0xff]  ;;  %vm44_vm0 = vcmask 261120  }
   0x2   :  { %v31_v2 = vld [vmem:[%s878_s1 + $0x10] sm:$0xff]  ;;  %v584_v3 = vpack.c.bf16 %v30_v1, %v29_v0  ;;  %v32_v4 = vld [vmem:[%s878_s1 + $0x18] sm:$0xff]  ;;  %v27_v5 = vld [vmem:[%s877_s0] sm:$0xff] }
   0x3   :  { %v588_v6 = vpack.c.bf16 %v32_v4, %v31_v2  ;;  %552 = vmatprep.mubr.msk.f32.mxu1 %vm44_vm0, %v27_v5  ;;  %v33_v7 = vld [vmem:[%s880_s3] sm:$0xff]  ;;  %v34_v8 = vld [vmem:[%s880_s3 + $0x8] sm:$0xff] }
   0x4   :  { %16 = vsyncpa [#allocation8], 0  ;;  %585 = vmatprep.subr.bf16.mxu1 %v584_v3  ;;  %v592_v9 = vpack.c.bf16 %v34_v8, %v33_v7  ;;  %v28_v10 = vld [vmem:[%s877_s0 + $0x8] sm:$0xff]  ;;  %v35_v11 = vld [vmem:[%s880_s3 + $0x10] sm:$0xff]  ;;  %vm214_vm1 = vcmask 130048   ;;  %v721_v26 = vmov 0.0|0.0   ;;  %v221_v27 = vlaneseq }
   0x5   :  { %587 = vmatpush3.bf16.msra.mxu1 %v584_v3  ;;  %v36_v12 = vld [vmem:[%s880_s3 + $0x18] sm:$0xff]  ;;  %v505_v14 = vld [vmem:[%s879_s2] ss:$0 sm:$0xff]  ;;  %vm601_vm2 = vmpackc.low %vm214_vm1, %vm214_vm1  ;;  %v722_v34 = vmov 0.0   ;;  %vm441_vm4 = vcmask 130112   ;;  %vm443_vm6 = vcmask 122880  }
   0x6   :  { %589 = vmatprep.subr.bf16.mxu1 %v588_v6  ;;  %v596_v13 = vpack.c.bf16 %v36_v12, %v35_v11  ;;  %602 = vmatprep.subr.msk.bf16.mxu0 %vm601_vm2, %v592_v9  ;;  %v508_v19 = vld [vmem:[%s881_s4] ss:$0 sm:$0xff]  ;;  %v222_v28 = vand.u32 127, %v221_v27  ;;  %v433_v29 = vshrl.u32 %v221_v27, 7  ;;  %v723_v40 = vmov 1.0|1.0  }
   0x7   :  { %605 = vmatpush3.bf16.xpose.msk.msra.mxu0 %vm601_vm2, %v592_v9  ;;  %vm724_vm9 = vmmov 0   ;;  %s725_s2 = smov [#allocation4]   ;;  %s726_s26 = smov [#allocation2]  }
   0x8   :  { %608 = vmatprep.subr.msk.bf16.mxu0 %vm601_vm2, %v596_v13  ;;  %v436_v30 = vadd.s32 4294967288, %v222_v28  ;;  %v434_v32 = vsub.s32 %v222_v28, %v433_v29  ;;  %vm332_vm8 = vcmp.lt.s32.totalorder %v222_v28, 16  ;;  %s466_s4 = sshll.u32 %s725_s2, 4  ;;  %s453_s27 = sshll.u32 %s726_s26, 4  ;;  %s467_s4 = int_to_ptr.vmem [resolvable:$true] %s466_s4  ;;  %s454_s27 = int_to_ptr.vmem [resolvable:$true] %s453_s27 }
   0x9   :  { %591 = vmatpush3.bf16.msra.mxu1 %v588_v6  ;;  %v519_v42 = vsel %vm332_vm8, 1.0, %v722_v34  ;;  %s627_s28 = scalar_lea.vmem %s467_s4, 16  ;;  %s631_s29 = scalar_lea.vmem %s467_s4, 32 }
   0xa   :  { %593 = vmatprep.subr.bf16.mxu1 %v592_v9  ;;  %v439_v33 = vsub.s32 %v436_v30, %v433_v29  ;;  %p628_p0 = scmp.ne.s32.totalorder %s467_s4, %s627_s28  ;;  %p632_p1 = scmp.lt.s32.totalorder %s467_s4, %s467_s4 }
   0xb   :  { %p633_p2 = scmp.lt.s32.totalorder %s631_s29, %s627_s28 }
   0xc   :  { %553 = vmatmul.mubr.msk.f32.vlgmr.msra.gmra.mrb[0].mxu1 %vm44_vm0, %v28_v10 }
   0xd   :  { %595 = vmatpush3.bf16.msra.mxu1 %v592_v9  ;;  %p634_p3 = por %p633_p2, %p632_p1 }
   0xe   :  { %597 = vmatprep.subr.bf16.mxu1 %v596_v13 }
   0xf   :  { %611 = vmatpush3.bf16.xpose.msk.msra.mxu0 %vm601_vm2, %v596_v13  ;;  %p635_p4 = pnand %p634_p3, %p628_p0 }
  0x11   :  { %599 = vmatpush3.bf16.msra.mxu1 %v596_v13 }
  0x12   :  { %612 = vmatprep.subr.bf16.mxu1 %v721_v26 }
  0xdf   :  { %v554_v15 = vpop.f32.mrb[0].mxu1 }
  0xe0   :  { %v117_v16 = vpop.f32.mrb[1].mxu1  ;;  %v123_v18 = vadd.f32 %v554_v15, %v505_v14 }
  0xe1   :  { %v118_v17 = vadd.f32 %v505_v14, %v117_v16 }
  0xe3   :  { %563 = vmatprep.mubr.msk.f32.mxu1 %vm44_vm0, %v118_v17 }
  0xe4   :  { %564 = vmatmul.mubr.msk.f32.vlgmr.msra.gmra.mrb[2].mxu1 %vm44_vm0, %v123_v18 }
  0xe5   :  { %581 = vmatprep.mubr.msk.f32.mxu1 %vm724_vm9, %v722_v34 }
 0x1b7   :  { %v565_v20 = vpop.f32.mrb[2].mxu1 }
 0x1b8   :  { %v205_v21 = vpop.f32.mrb[3].mxu1  ;;  %v211_v23 = vadd.f32 %v565_v20, %v508_v19 }
 0x1b9   :  { %v206_v22 = vadd.f32 %v508_v19, %v205_v21 }
 0x1ba   :  { %v218_v25 = vsel %vm214_vm1, %v211_v23, -inf }
 0x1bb   :  { %v215_v24 = vsel %vm214_vm1, %v206_v22, -inf }
 0x1bc   :  { %216 = vmax.index.xlane.f32.xlu0 %v215_v24 }
 0x1c0   :  { %219 = vmax.index.xlane.f32.xlu0 %v218_v25 }
 0x249   :  { %v217_v31 = vpop.xlane.xlu0 %216 }
 0x24a   :  { %vm223_vm3 = vcmp.eq.s32.totalorder %v222_v28, %v217_v31  ;;  %v435_v37 = vrot.slane %v217_v31, %v434_v32 }
 0x24b   :  { %v511_v35 = vsel %vm223_vm3, 1.0, %v722_v34 }
 0x24c   :  { %574 = vmatprep.mubr.msk.f32.mxu0 %vm214_vm1, %v511_v35 }
 0x24d   :  { %v220_v36 = vpop.xlane.xlu0 %219 }
 0x24e   :  { %vm224_vm5 = vcmp.eq.s32.totalorder %v222_v28, %v220_v36  ;;  %v440_v38 = vrot.slane %v220_v36, %v439_v33 }
 0x24f   :  { %v512_v39 = vsel %vm224_vm5, 1.0, %v722_v34  ;;  %vm613_vm7 = vmpackc.low %vm224_vm5, %vm223_vm3 }
 0x250   :  { %575 = vmatmul.mubr.msk.f32.vlgmr.msra.gmra.mrb[0].mxu0 %vm214_vm1, %v512_v39  ;;  %614 = vmatpush3.bf16.msk.msra.mxu1 %vm613_vm7, %v723_v40  ;;  %v442_v41 = vsel %vm441_vm4, %v440_v38, %v435_v37 }
 0x251   :  { %444 = vst.msk [vmem:[#allocation4] sm:$0x1] %vm443_vm6, %v442_v41 }
 0x253   :  { %582 = vmatmul.mubr.msk.f32.vlgmr.msra.gmra.mrb[4].mxu1 %vm214_vm1, %v519_v42 }
 0x323   :  { %v576_v43 = vpop.f32.mrb[0].mxu0 }
 0x324   :  { %v336_v44 = vsub.f32 %v123_v18, %v576_v43  ;;  %431 = vst.msk [vmem:[#allocation2 + $0x8] sm:$0xff] %vm44_vm0, %v576_v43  ;;  %v313_v45 = vpop.f32.mrb[1].mxu0 }
 0x325   :  { %v335_v46 = vsub.f32 %v118_v17, %v313_v45  ;;  %430 = vst.msk [vmem:[#allocation2] sm:$0xff] %vm44_vm0, %v313_v45 }
 0x326   :  { %v344_v47 = vmul.f32 %v336_v44, %v336_v44  ;;  %v426_v52 = vpop.f32.mrb[4].mxu1 }
 0x327   :  { %v343_v48 = vmul.f32 %v335_v46, %v335_v46  ;;  %447 = vst.msk [vmem:[#allocation7] sm:$0x1] %vm443_vm6, %v426_v52  ;;  %v583_v53 = vpop.f32.mrb[5].mxu1 }
 0x328   :  { %v346_v49 = vsel %vm44_vm0, %v344_v47, 0.0 }
 0x329   :  { %v345_v50 = vsel %vm44_vm0, %v343_v48, 0.0 }
 0x32a   :  { %v347_v51 = vadd.f32 %v346_v49, %v345_v50 }
 0x32c   :  { %348 = vadd.xlane.f32.xlu1 %v347_v51 }
 0x32d   :  { %638 = shalt.err (!%p635_p4)
}
 0x32e   :  { %s639_s10 = scalar_lea.hbm %s883_s6, 16 }
 0x32f   :  { %p640_p5 = scmp.ne.s32.totalorder %s883_s6, %s639_s10  ;;  %p643_p6 = scmp.lt.u32.totalorder %s639_s10, %s883_s6 }
 0x331   :  { %p645_p7 = pnand %p643_p6, %p640_p5 }
 0x333   :  { %648 = shalt.err (!%p645_p7)
}
 0x334   :  { %469 = dma.vmem_to_hbm [thread:$0]  %s467_s4, 16, %s883_s6, [#allocation5]  }
 0x335   :  { %s649_s17 = scalar_lea.vmem %s454_s27, 256  ;;  %p654_p9 = scmp.lt.s32.totalorder %s454_s27, %s454_s27 }
 0x336   :  { %p650_p8 = scmp.ne.s32.totalorder %s454_s27, %s649_s17  ;;  %p655_p10 = scmp.lt.s32.totalorder %s649_s17, %s649_s17 }
 0x338   :  { %p656_p11 = por %p655_p10, %p654_p9 }
 0x33a   :  { %p657_p12 = pnand %p656_p11, %p650_p8 }
 0x33c   :  { %660 = shalt.err (!%p657_p12)
}
 0x33d   :  { %s661_s19 = scalar_lea.hbm %s882_s5, 256 }
 0x33e   :  { %p662_p13 = scmp.ne.s32.totalorder %s882_s5, %s661_s19  ;;  %p665_p0 = scmp.lt.u32.totalorder %s661_s19, %s882_s5 }
 0x340   :  { %p667_p1 = pnand %p665_p0, %p662_p13 }
 0x342   :  { %670 = shalt.err (!%p667_p1)
}
 0x343   :  { %s727_s6 = smov 128   ;;  %s728_s24 = smov 8  }
 0x344   :  { %459 = dma.vmem_to_hbm [thread:$0]  %s454_s27, 256, %s882_s5, [#allocation3], %s727_s6, %s727_s6, %s728_s24  }
 0x345   :  { %s729_s3 = smov [#allocation7]  }
 0x346   :  { %s486_s2 = sshll.u32 %s729_s3, 4  ;;  %s487_s2 = int_to_ptr.vmem [resolvable:$true] %s486_s2 }
 0x347   :  { %s671_s4 = scalar_lea.vmem %s487_s2, 16  ;;  %s675_s26 = scalar_lea.vmem %s487_s2, 32 }
 0x348   :  { %p672_p2 = scmp.ne.s32.totalorder %s487_s2, %s671_s4  ;;  %p676_p3 = scmp.lt.s32.totalorder %s487_s2, %s487_s2 }
 0x349   :  { %p677_p4 = scmp.lt.s32.totalorder %s675_s26, %s671_s4 }
 0x34b   :  { %p678_p5 = por %p677_p4, %p676_p3 }
 0x34d   :  { %p679_p6 = pnand %p678_p5, %p672_p2 }
 0x34f   :  { %682 = shalt.err (!%p679_p6)
}
 0x350   :  { %s683_s30 = scalar_lea.hbm %s885_s8, 16 }
 0x351   :  { %p684_p7 = scmp.ne.s32.totalorder %s885_s8, %s683_s30  ;;  %p687_p8 = scmp.lt.u32.totalorder %s683_s30, %s885_s8 }
 0x353   :  { %p689_p9 = pnand %p687_p8, %p684_p7 }
 0x355   :  { %692 = shalt.err (!%p689_p9)
}
 0x356   :  { %489 = dma.vmem_to_hbm [thread:$0]  %s487_s2, 16, %s885_s8, [#allocation8]  }
 0x357   :  { %s730_s13 = smov [#allocation6]  }
 0x358   :  { %s476_s14 = sshll.u32 %s730_s13, 4  ;;  %s477_s14 = int_to_ptr.vmem [resolvable:$true] %s476_s14 }
 0x359   :  { %s693_s16 = scalar_lea.vmem %s477_s14, 16  ;;  %s697_s17 = scalar_lea.vmem %s477_s14, 32 }
 0x35a   :  { %p694_p10 = scmp.ne.s32.totalorder %s477_s14, %s693_s16  ;;  %p698_p11 = scmp.lt.s32.totalorder %s477_s14, %s477_s14 }
 0x35b   :  { %p699_p12 = scmp.lt.s32.totalorder %s697_s17, %s693_s16 }
 0x35d   :  { %p700_p13 = por %p699_p12, %p698_p11 }
 0x35f   :  { %p701_p0 = pnand %p700_p13, %p694_p10 }
 0x3b9   :  { %v349_v54 = vpop.xlane.xlu1 %348 }
 0x3ba   :  { %v350_v55 = vrot.slane %v349_v54, 4 }
 0x3bc   :  { %v351_v56 = vadd.f32 %v350_v55, %v349_v54 }
 0x3be   :  { %v352_v57 = vrot.slane %v351_v56, 2 }
 0x3c0   :  { %v353_v58 = vadd.f32 %v352_v57, %v351_v56 }
 0x3c2   :  { %v354_v59 = vrot.slane %v353_v58, 1 }
 0x3c4   :  { %v355_v60 = vadd.f32 %v354_v59, %v353_v58 }
 0x3c6   :  { %615 = vpush %v355_v60 }
 0x3f7   :  { %s616_s15 = spop %615 }
 0x3f8   :  { %v445_v61 = vstv %s616_s15 }
 0x3f9   :  { %446 = vst [vmem:[#allocation6] sm:$0x1] %v445_v61 }
 0x3fa   :  { %704 = shalt.err (!%p701_p0)
}
 0x3fb   :  { %s705_s1 = scalar_lea.hbm %s884_s7, 16 }
 0x3fc   :  { %p706_p1 = scmp.ne.s32.totalorder %s884_s7, %s705_s1  ;;  %p709_p2 = scmp.lt.u32.totalorder %s705_s1, %s884_s7 }
 0x3fe   :  { %p711_p3 = pnand %p709_p2, %p706_p1 }
 0x400   :  { %714 = shalt.err (!%p711_p3)
}
 0x401   :  { %479 = dma.vmem_to_hbm [thread:$0]  %s477_s14, 16, %s884_s7, [#allocation5]  }
 0x402   :  { %715 = dma.done.wait [#allocation3], 256  }
 0x403   :  { %716 = vsyncadd [#allocation3], 4294967040 }
 0x404   :  { %717 = dma.done.wait [#allocation5], 32  }
 0x405   :  { %718 = vsyncadd [#allocation5], 4294967264 }
 0x406   :  { %719 = dma.done.wait [#allocation8], 16  }
 0x407   :  { %720 = vsyncadd [#allocation8], 4294967280 }
 0x408   :  { %502 = vsyncpa [#allocation3], 1 }
 0x409   :  { %503 = vsyncpa [#allocation5], 1 }
 0x40a   :  { %504 = vsyncpa [#allocation8], 1 }

// kernel: tpu_custom_call.1
= control target key start
LH: loop header
LB: loop body
LE: loop exit
PB: predicated region body
PF: predicated region fallthrough
CT: control target
= control target key end

     0   :  { %14 = vsyncpa [#allocation3], 0  ;;  %s877_s0 = inlined_call_operand.vmem [shape: f32[16,32], index: 0, kind: input, shape index: {}]   ;;  %s878_s1 = inlined_call_operand.vmem [shape: f32[32,32], index: 1, kind: input, shape index: {}]   ;;  %s879_s2 = inlined_call_operand.vmem [shape: f32[1,32], index: 2, kind: input, shape index: {}]   ;;  %s880_s3 = inlined_call_operand.vmem [shape: f32[32,16], index: 3, kind: input, shape index: {}]   ;;  %s881_s4 = inlined_call_operand.vmem [shape: f32[1,16], index: 4, kind: input, shape index: {}]   ;;  %s882_s5 = inlined_call_operand.hbm [shape: f32[16,32], index: 5, kind: output, shape index: {0}]   ;;  %s883_s6 = inlined_call_operand.hbm [shape: s32[1,1,16], index: 6, kind: output, shape index: {1}]   ;;  %s884_s7 = inlined_call_operand.hbm [shape: f32[1,1,128], index: 7, kind: output, shape index: {2}]   ;;  %s885_s8 = inlined_call_operand.hbm [shape: f32[1,1,16], index: 8, kind: output, shape index: {3}]  }
   0x1   :  { %15 = vsyncpa [#allocation5], 0  ;;  %v29_v0 = vld [vmem:[%s878_s1] sm:$0xff]  ;;  %v30_v1 = vld [vmem:[%s878_s1 + $0x8] sm:$0xff]  ;;  %vm44_vm0 = vcmask 261120  }
   0x2   :  { %v31_v2 = vld [vmem:[%s878_s1 + $0x10] sm:$0xff]  ;;  %v584_v3 = vpack.c.bf16 %v30_v1, %v29_v0  ;;  %v32_v4 = vld [vmem:[%s878_s1 + $0x18] sm:$0xff]  ;;  %v27_v5 = vld [vmem:[%s877_s0] sm:$0xff] }
   0x3   :  { %v588_v6 = vpack.c.bf16 %v32_v4, %v31_v2  ;;  %552 = vmatprep.mubr.msk.f32.mxu1 %vm44_vm0, %v27_v5  ;;  %v33_v7 = vld [vmem:[%s880_s3] sm:$0xff]  ;;  %v34_v8 = vld [vmem:[%s880_s3 + $0x8] sm:$0xff] }
   0x4   :  { %16 = vsyncpa [#allocation8], 0  ;;  %585 = vmatprep.subr.bf16.mxu1 %v584_v3  ;;  %v592_v9 = vpack.c.bf16 %v34_v8, %v33_v7  ;;  %v28_v10 = vld [vmem:[%s877_s0 + $0x8] sm:$0xff]  ;;  %v35_v11 = vld [vmem:[%s880_s3 + $0x10] sm:$0xff]  ;;  %vm214_vm1 = vcmask 130048   ;;  %v721_v26 = vmov 0.0|0.0   ;;  %v221_v27 = vlaneseq }
   0x5   :  { %587 = vmatpush3.bf16.msra.mxu1 %v584_v3  ;;  %v36_v12 = vld [vmem:[%s880_s3 + $0x18] sm:$0xff]  ;;  %v505_v14 = vld [vmem:[%s879_s2] ss:$0 sm:$0xff]  ;;  %vm601_vm2 = vmpackc.low %vm214_vm1, %vm214_vm1  ;;  %v722_v34 = vmov 0.0   ;;  %vm441_vm4 = vcmask 130112   ;;  %vm443_vm6 = vcmask 122880  }
   0x6   :  { %589 = vmatprep.subr.bf16.mxu1 %v588_v6  ;;  %v596_v13 = vpack.c.bf16 %v36_v12, %v35_v11  ;;  %602 = vmatprep.subr.msk.bf16.mxu0 %vm601_vm2, %v592_v9  ;;  %v508_v19 = vld [vmem:[%s881_s4] ss:$0 sm:$0xff]  ;;  %v222_v28 = vand.u32 127, %v221_v27  ;;  %v433_v29 = vshrl.u32 %v221_v27, 7  ;;  %v723_v40 = vmov 1.0|1.0  }
   0x7   :  { %605 = vmatpush3.bf16.xpose.msk.msra.mxu0 %vm601_vm2, %v592_v9  ;;  %vm724_vm9 = vmmov 0   ;;  %s725_s2 = smov [#allocation4]   ;;  %s726_s26 = smov [#allocation2]  }
   0x8   :  { %608 = vmatprep.subr.msk.bf16.mxu0 %vm601_vm2, %v596_v13  ;;  %v436_v30 = vadd.s32 4294967288, %v222_v28  ;;  %v434_v32 = vsub.s32 %v222_v28, %v433_v29  ;;  %vm332_vm8 = vcmp.lt.s32.totalorder %v222_v28, 16  ;;  %s466_s4 = sshll.u32 %s725_s2, 4  ;;  %s453_s27 = sshll.u32 %s726_s26, 4  ;;  %s467_s4 = int_to_ptr.vmem [resolvable:$true] %s466_s4  ;;  %s454_s27 = int_to_ptr.vmem [resolvable:$true] %s453_s27 }
   0x9   :  { %591 = vmatpush3.bf16.msra.mxu1 %v588_v6  ;;  %v519_v42 = vsel %vm332_vm8, 1.0, %v722_v34  ;;  %s627_s28 = scalar_lea.vmem %s467_s4, 16  ;;  %s631_s29 = scalar_lea.vmem %s467_s4, 32 }
   0xa   :  { %593 = vmatprep.subr.bf16.mxu1 %v592_v9  ;;  %v439_v33 = vsub.s32 %v436_v30, %v433_v29  ;;  %p628_p0 = scmp.ne.s32.totalorder %s467_s4, %s627_s28  ;;  %p632_p1 = scmp.lt.s32.totalorder %s467_s4, %s467_s4 }
   0xb   :  { %p633_p2 = scmp.lt.s32.totalorder %s631_s29, %s627_s28 }
   0xc   :  { %553 = vmatmul.mubr.msk.f32.vlgmr.msra.gmra.mrb[0].mxu1 %vm44_vm0, %v28_v10 }
   0xd   :  { %595 = vmatpush3.bf16.msra.mxu1 %v592_v9  ;;  %p634_p3 = por %p633_p2, %p632_p1 }
   0xe   :  { %597 = vmatprep.subr.bf16.mxu1 %v596_v13 }
   0xf   :  { %611 = vmatpush3.bf16.xpose.msk.msra.mxu0 %vm601_vm2, %v596_v13  ;;  %p635_p4 = pnand %p634_p3, %p628_p0 }
  0x11   :  { %599 = vmatpush3.bf16.msra.mxu1 %v596_v13 }
  0x12   :  { %612 = vmatprep.subr.bf16.mxu1 %v721_v26 }
  0xdf   :  { %v554_v15 = vpop.f32.mrb[0].mxu1 }
  0xe0   :  { %v117_v16 = vpop.f32.mrb[1].mxu1  ;;  %v123_v18 = vadd.f32 %v554_v15, %v505_v14 }
  0xe1   :  { %v118_v17 = vadd.f32 %v505_v14, %v117_v16 }
  0xe3   :  { %563 = vmatprep.mubr.msk.f32.mxu1 %vm44_vm0, %v118_v17 }
  0xe4   :  { %564 = vmatmul.mubr.msk.f32.vlgmr.msra.gmra.mrb[2].mxu1 %vm44_vm0, %v123_v18 }
  0xe5   :  { %581 = vmatprep.mubr.msk.f32.mxu1 %vm724_vm9, %v722_v34 }
 0x1b7   :  { %v565_v20 = vpop.f32.mrb[2].mxu1 }
 0x1b8   :  { %v205_v21 = vpop.f32.mrb[3].mxu1  ;;  %v211_v23 = vadd.f32 %v565_v20, %v508_v19 }
 0x1b9   :  { %v206_v22 = vadd.f32 %v508_v19, %v205_v21 }
 0x1ba   :  { %v218_v25 = vsel %vm214_vm1, %v211_v23, -inf }
 0x1bb   :  { %v215_v24 = vsel %vm214_vm1, %v206_v22, -inf }
 0x1bc   :  { %216 = vmax.index.xlane.f32.xlu0 %v215_v24 }
 0x1c0   :  { %219 = vmax.index.xlane.f32.xlu0 %v218_v25 }
 0x249   :  { %v217_v31 = vpop.xlane.xlu0 %216 }
 0x24a   :  { %vm223_vm3 = vcmp.eq.s32.totalorder %v222_v28, %v217_v31  ;;  %v435_v37 = vrot.slane %v217_v31, %v434_v32 }
 0x24b   :  { %v511_v35 = vsel %vm223_vm3, 1.0, %v722_v34 }
 0x24c   :  { %574 = vmatprep.mubr.msk.f32.mxu0 %vm214_vm1, %v511_v35 }
 0x24d   :  { %v220_v36 = vpop.xlane.xlu0 %219 }
 0x24e   :  { %vm224_vm5 = vcmp.eq.s32.totalorder %v222_v28, %v220_v36  ;;  %v440_v38 = vrot.slane %v220_v36, %v439_v33 }
 0x24f   :  { %v512_v39 = vsel %vm224_vm5, 1.0, %v722_v34  ;;  %vm613_vm7 = vmpackc.low %vm224_vm5, %vm223_vm3 }
 0x250   :  { %575 = vmatmul.mubr.msk.f32.vlgmr.msra.gmra.mrb[0].mxu0 %vm214_vm1, %v512_v39  ;;  %614 = vmatpush3.bf16.msk.msra.mxu1 %vm613_vm7, %v723_v40  ;;  %v442_v41 = vsel %vm441_vm4, %v440_v38, %v435_v37 }
 0x251   :  { %444 = vst.msk [vmem:[#allocation4] sm:$0x1] %vm443_vm6, %v442_v41 }
 0x253   :  { %582 = vmatmul.mubr.msk.f32.vlgmr.msra.gmra.mrb[4].mxu1 %vm214_vm1, %v519_v42 }
 0x323   :  { %v576_v43 = vpop.f32.mrb[0].mxu0 }
 0x324   :  { %v336_v44 = vsub.f32 %v123_v18, %v576_v43  ;;  %431 = vst.msk [vmem:[#allocation2 + $0x8] sm:$0xff] %vm44_vm0, %v576_v43  ;;  %v313_v45 = vpop.f32.mrb[1].mxu0 }
 0x325   :  { %v335_v46 = vsub.f32 %v118_v17, %v313_v45  ;;  %430 = vst.msk [vmem:[#allocation2] sm:$0xff] %vm44_vm0, %v313_v45 }
 0x326   :  { %v344_v47 = vmul.f32 %v336_v44, %v336_v44  ;;  %v426_v52 = vpop.f32.mrb[4].mxu1 }
 0x327   :  { %v343_v48 = vmul.f32 %v335_v46, %v335_v46  ;;  %447 = vst.msk [vmem:[#allocation7] sm:$0x1] %vm443_vm6, %v426_v52  ;;  %v583_v53 = vpop.f32.mrb[5].mxu1 }
 0x328   :  { %v346_v49 = vsel %vm44_vm0, %v344_v47, 0.0 }
 0x329   :  { %v345_v50 = vsel %vm44_vm0, %v343_v48, 0.0 }
 0x32a   :  { %v347_v51 = vadd.f32 %v346_v49, %v345_v50 }
 0x32c   :  { %348 = vadd.xlane.f32.xlu1 %v347_v51 }
 0x32d   :  { %638 = shalt.err (!%p635_p4)
}
 0x32e   :  { %s639_s10 = scalar_lea.hbm %s883_s6, 16 }
 0x32f   :  { %p640_p5 = scmp.ne.s32.totalorder %s883_s6, %s639_s10  ;;  %p643_p6 = scmp.lt.u32.totalorder %s639_s10, %s883_s6 }
 0x331   :  { %p645_p7 = pnand %p643_p6, %p640_p5 }
 0x333   :  { %648 = shalt.err (!%p645_p7)
}
 0x334   :  { %469 = dma.vmem_to_hbm [thread:$0]  %s467_s4, 16, %s883_s6, [#allocation5]  }
 0x335   :  { %s649_s17 = scalar_lea.vmem %s454_s27, 256  ;;  %p654_p9 = scmp.lt.s32.totalorder %s454_s27, %s454_s27 }
 0x336   :  { %p650_p8 = scmp.ne.s32.totalorder %s454_s27, %s649_s17  ;;  %p655_p10 = scmp.lt.s32.totalorder %s649_s17, %s649_s17 }
 0x338   :  { %p656_p11 = por %p655_p10, %p654_p9 }
 0x33a   :  { %p657_p12 = pnand %p656_p11, %p650_p8 }
 0x33c   :  { %660 = shalt.err (!%p657_p12)
}
 0x33d   :  { %s661_s19 = scalar_lea.hbm %s882_s5, 256 }
 0x33e   :  { %p662_p13 = scmp.ne.s32.totalorder %s882_s5, %s661_s19  ;;  %p665_p0 = scmp.lt.u32.totalorder %s661_s19, %s882_s5 }
 0x340   :  { %p667_p1 = pnand %p665_p0, %p662_p13 }
 0x342   :  { %670 = shalt.err (!%p667_p1)
}
 0x343   :  { %s727_s6 = smov 128   ;;  %s728_s24 = smov 8  }
 0x344   :  { %459 = dma.vmem_to_hbm [thread:$0]  %s454_s27, 256, %s882_s5, [#allocation3], %s727_s6, %s727_s6, %s728_s24  }
 0x345   :  { %s729_s3 = smov [#allocation7]  }
 0x346   :  { %s486_s2 = sshll.u32 %s729_s3, 4  ;;  %s487_s2 = int_to_ptr.vmem [resolvable:$true] %s486_s2 }
 0x347   :  { %s671_s4 = scalar_lea.vmem %s487_s2, 16  ;;  %s675_s26 = scalar_lea.vmem %s487_s2, 32 }
 0x348   :  { %p672_p2 = scmp.ne.s32.totalorder %s487_s2, %s671_s4  ;;  %p676_p3 = scmp.lt.s32.totalorder %s487_s2, %s487_s2 }
 0x349   :  { %p677_p4 = scmp.lt.s32.totalorder %s675_s26, %s671_s4 }
 0x34b   :  { %p678_p5 = por %p677_p4, %p676_p3 }
 0x34d   :  { %p679_p6 = pnand %p678_p5, %p672_p2 }
 0x34f   :  { %682 = shalt.err (!%p679_p6)
}
 0x350   :  { %s683_s30 = scalar_lea.hbm %s885_s8, 16 }
 0x351   :  { %p684_p7 = scmp.ne.s32.totalorder %s885_s8, %s683_s30  ;;  %p687_p8 = scmp.lt.u32.totalorder %s683_s30, %s885_s8 }
 0x353   :  { %p689_p9 = pnand %p687_p8, %p684_p7 }
 0x355   :  { %692 = shalt.err (!%p689_p9)
}
 0x356   :  { %489 = dma.vmem_to_hbm [thread:$0]  %s487_s2, 16, %s885_s8, [#allocation8]  }
 0x357   :  { %s730_s13 = smov [#allocation6]  }
 0x358   :  { %s476_s14 = sshll.u32 %s730_s13, 4  ;;  %s477_s14 = int_to_ptr.vmem [resolvable:$true] %s476_s14 }
 0x359   :  { %s693_s16 = scalar_lea.vmem %s477_s14, 16  ;;  %s697_s17 = scalar_lea.vmem %s477_s14, 32 }
 0x35a   :  { %p694_p10 = scmp.ne.s32.totalorder %s477_s14, %s693_s16  ;;  %p698_p11 = scmp.lt.s32.totalorder %s477_s14, %s477_s14 }
 0x35b   :  { %p699_p12 = scmp.lt.s32.totalorder %s697_s17, %s693_s16 }
 0x35d   :  { %p700_p13 = por %p699_p12, %p698_p11 }
 0x35f   :  { %p701_p0 = pnand %p700_p13, %p694_p10 }
 0x3b9   :  { %v349_v54 = vpop.xlane.xlu1 %348 }
 0x3ba   :  { %v350_v55 = vrot.slane %v349_v54, 4 }
 0x3bc   :  { %v351_v56 = vadd.f32 %v350_v55, %v349_v54 }
 0x3be   :  { %v352_v57 = vrot.slane %v351_v56, 2 }
 0x3c0   :  { %v353_v58 = vadd.f32 %v352_v57, %v351_v56 }
 0x3c2   :  { %v354_v59 = vrot.slane %v353_v58, 1 }
 0x3c4   :  { %v355_v60 = vadd.f32 %v354_v59, %v353_v58 }
 0x3c6   :  { %615 = vpush %v355_v60 }
 0x3f7   :  { %s616_s15 = spop %615 }
 0x3f8   :  { %v445_v61 = vstv %s616_s15 }
 0x3f9   :  { %446 = vst [vmem:[#allocation6] sm:$0x1] %v445_v61 }
 0x3fa   :  { %704 = shalt.err (!%p701_p0)
}
 0x3fb   :  { %s705_s1 = scalar_lea.hbm %s884_s7, 16 }
 0x3fc   :  { %p706_p1 = scmp.ne.s32.totalorder %s884_s7, %s705_s1  ;;  %p709_p2 = scmp.lt.u32.totalorder %s705_s1, %s884_s7 }
 0x3fe   :  { %p711_p3 = pnand %p709_p2, %p706_p1 }
 0x400   :  { %714 = shalt.err (!%p711_p3)
}
 0x401   :  { %479 = dma.vmem_to_hbm [thread:$0]  %s477_s14, 16, %s884_s7, [#allocation5]  }
 0x402   :  { %715 = dma.done.wait [#allocation3], 256  }
 0x403   :  { %716 = vsyncadd [#allocation3], 4294967040 }
 0x404   :  { %717 = dma.done.wait [#allocation5], 32  }
 0x405   :  { %718 = vsyncadd [#allocation5], 4294967264 }
 0x406   :  { %719 = dma.done.wait [#allocation8], 16  }
 0x407   :  { %720 = vsyncadd [#allocation8], 4294967280 }
 0x408   :  { %502 = vsyncpa [#allocation3], 1 }
 0x409   :  { %503 = vsyncpa [#allocation5], 1 }
 0x40a   :  { %504 = vsyncpa [#allocation8], 1 }

</bundles_post_ra>
